<compile_context>
chip_gen: v7x
topology: tpu7x:2x2x1
jax: 0.10.0
libtpu: 0.0.40
codegen_flags: <defaults>
</compile_context>

<pallas_src>
import functools

import jax
import jax.numpy as jnp
from jax.experimental import pallas as pl
from jax.experimental.pallas import tpu as pltpu


def _round_up(n, m):
    return ((n + m - 1) // m) * m


def _encoder_kernel(x_ref,
                    w1_ref, b1_ref,
                    w2_ref, b2_ref,
                    w3_ref, b3_ref,
                    wh_ref, bh_ref,
                    out_ref, *, n_out):
    """One batch tile: 4 MXU matmuls (heads fused), f32 accumulate, f32 epilogue."""
    x = x_ref[...]                                                   # bf16 [TB, n_in]
    h = jnp.tanh(jnp.dot(x, w1_ref[...],
                         preferred_element_type=jnp.float32) + b1_ref[...])
    h = jnp.tanh(jnp.dot(h.astype(jnp.bfloat16), w2_ref[...],
                         preferred_element_type=jnp.float32) + b2_ref[...])
    h = jnp.tanh(jnp.dot(h.astype(jnp.bfloat16), w3_ref[...],
                         preferred_element_type=jnp.float32) + b3_ref[...])
    # Fused mu | log_sigma_sq head, output padded to a lane-dense width.
    y = jnp.dot(h.astype(jnp.bfloat16), wh_ref[...],
                preferred_element_type=jnp.float32) + bh_ref[...]    # f32 [TB, H_pad]
    # tanh only applies to the mu columns [0, n_out); log_sigma_sq stays linear.
    col = jax.lax.broadcasted_iota(jnp.int32, y.shape, dimension=1)
    out_ref[...] = jnp.where(col < n_out, jnp.tanh(y), y).astype(out_ref.dtype)


def _const_spec(arr):
    """Whole-array block with a constant index_map -> DMA'd once, VMEM-resident."""
    ndim = arr.ndim
    return pl.BlockSpec(arr.shape, lambda i: (0,) * ndim)


@jax.jit
def encoder_forward(x, params):
    """x: [B, n_in] float32. params: dict of transposed f32 weights / biases.

    Returns (mu, log_sigma_sq), each [B, n_out] float32.
    """
    B, n_in = x.shape
    n_out = params["wmu"].shape[1]
    H_pad = _round_up(2 * n_out, 128)                 # lane-dense fused-head width

    # --- one-time (per call, tiny) param prep: fuse heads, pad, cast to bf16 ---
    w_head = jnp.concatenate([params["wmu"], params["wls"]], axis=1)   # [64, 2*n_out]
    b_head = jnp.concatenate([params["bmu"], params["bls"]], axis=1)   # [1, 2*n_out]
    w_head = jnp.pad(w_head, ((0, 0), (0, H_pad - 2 * n_out)))
    b_head = jnp.pad(b_head, ((0, 0), (0, H_pad - 2 * n_out)))

    w1 = params["w1"].astype(jnp.bfloat16)
    w2 = params["w2"].astype(jnp.bfloat16)
    w3 = params["w3"].astype(jnp.bfloat16)
    wh = w_head.astype(jnp.bfloat16)
    b1, b2, b3, bh = params["b1"], params["b2"], params["b3"], b_head   # f32 biases

    # --- batch tiling: TB rows per grid step, pad B up to a multiple of TB ---
    # 512 rows fills the MXU on all generations (multiple of 128 and 256) and the
    # whole working set (<2 MiB) sits far below every chip's scoped-VMEM budget.
    TB = min(512, _round_up(B, 8))
    B_pad = _round_up(B, TB)
    x_p = jnp.pad(x, ((0, B_pad - B), (0, 0))).astype(jnp.bfloat16)
    grid = (B_pad // TB,)

    kernel = functools.partial(_encoder_kernel, n_out=n_out)

    # Advisory cost hint so XLA schedules surrounding ops sensibly.
    flops = 2 * B_pad * (n_in * 256 + 256 * 128 + 128 * 64 + 64 * H_pad)
    transcendentals = B_pad * (256 + 128 + 64 + H_pad)
    weight_bytes = 2 * (n_in * 256 + 256 * 128 + 128 * 64 + 64 * H_pad) \
        + 4 * (256 + 128 + 64 + H_pad)
    bytes_accessed = B_pad * n_in * 2 + B_pad * H_pad * 4 + weight_bytes

    out = pl.pallas_call(
        kernel,
        out_shape=jax.ShapeDtypeStruct((B_pad, H_pad), jnp.float32),
        grid=grid,
        in_specs=[
            pl.BlockSpec((TB, n_in), lambda i: (i, 0)),   # x tile (pipelined)
            _const_spec(w1), _const_spec(b1),
            _const_spec(w2), _const_spec(b2),
            _const_spec(w3), _const_spec(b3),
            _const_spec(wh), _const_spec(bh),
        ],
        out_specs=pl.BlockSpec((TB, H_pad), lambda i: (i, 0)),
        compiler_params=pltpu.CompilerParams(
            dimension_semantics=("parallel",),            # shard batch over TCs (v7x)
            vmem_limit_bytes=32 * 1024 * 1024,
        ),
        cost_estimate=pl.CostEstimate(
            flops=flops,
            transcendentals=transcendentals,
            bytes_accessed=bytes_accessed,
        ),
    )(x_p, w1, b1, w2, b2, w3, b3, wh, bh)

    mu = out[:B, :n_out]
    log_sigma_sq = out[:B, n_out:2 * n_out]
    return mu, log_sigma_sq


def _init_linear(key, fan_in, fan_out):
    """PyTorch nn.Linear default init (U[-1/sqrt(in), 1/sqrt(in)]).

    Weight returned transposed to [fan_in, fan_out]; bias as [1, fan_out]."""
    kw, kb = jax.random.split(key)
    bound = 1.0 / jnp.sqrt(jnp.float32(fan_in))
    w = jax.random.uniform(kw, (fan_in, fan_out), jnp.float32, -bound, bound)
    b = jax.random.uniform(kb, (1, fan_out), jnp.float32, -bound, bound)
    return w, b


def make_params(key, n_in, n_out):
    keys = jax.random.split(key, 5)
    w1, b1 = _init_linear(keys[0], n_in, 256)
    w2, b2 = _init_linear(keys[1], 256, 128)
    w3, b3 = _init_linear(keys[2], 128, 64)
    wmu, bmu = _init_linear(keys[3], 64, n_out)
    wls, bls = _init_linear(keys[4], 64, n_out)
    return dict(w1=w1, b1=b1, w2=w2, b2=b2, w3=w3, b3=b3,
                wmu=wmu, bmu=bmu, wls=wls, bls=bls)


def encoder_reference(x, p):
    h = jnp.tanh(x @ p["w1"] + p["b1"])
    h = jnp.tanh(h @ p["w2"] + p["b2"])
    h = jnp.tanh(h @ p["w3"] + p["b3"])
    return jnp.tanh(h @ p["wmu"] + p["bmu"]), h @ p["wls"] + p["bls"]


if __name__ == "__main__":
    key = jax.random.PRNGKey(0)
    k_x, k_p, k_x2 = jax.random.split(key, 3)

    B, n_in, n_out = 8, 32, 16
    x = jax.random.normal(k_x, (B, n_in), jnp.float32)
    params = make_params(k_p, n_in, n_out)

    mu, log_sigma_sq = encoder_forward(x, params)
    jax.block_until_ready((mu, log_sigma_sq))

    # Correctness vs f32 reference (kernel matmuls run in bf16 -> relaxed tol).
    mu_ref, ls_ref = encoder_reference(x, params)
    assert mu.shape == (B, n_out) and log_sigma_sq.shape == (B, n_out)
    assert jnp.allclose(mu, mu_ref, atol=5e-2, rtol=5e-2)
    assert jnp.allclose(log_sigma_sq, ls_ref, atol=5e-2, rtol=5e-2)

    # Exercise the multi-step batch grid + padding path as well.
    B2 = 600
    x2 = jax.random.normal(k_x2, (B2, n_in), jnp.float32)
    mu2, ls2 = encoder_forward(x2, params)
    jax.block_until_ready((mu2, ls2))
    mu2_ref, ls2_ref = encoder_reference(x2, params)
    assert mu2.shape == (B2, n_out) and ls2.shape == (B2, n_out)
    assert jnp.allclose(mu2, mu2_ref, atol=5e-2, rtol=5e-2)
    assert jnp.allclose(ls2, ls2_ref, atol=5e-2, rtol=5e-2)

    print("KERNEL_OK")
</pallas_src>

<mosaic_0001>
module attributes {stable_mosaic.version = 11 : i64} {
  func.func @_encoder_kernel(%arg0: i32, %arg1: memref<8x32xbf16, #tpu.memory_space<vmem>>, %arg2: memref<32x256xbf16, #tpu.memory_space<vmem>>, %arg3: memref<1x256xf32, #tpu.memory_space<vmem>>, %arg4: memref<256x128xbf16, #tpu.memory_space<vmem>>, %arg5: memref<1x128xf32, #tpu.memory_space<vmem>>, %arg6: memref<128x64xbf16, #tpu.memory_space<vmem>>, %arg7: memref<1x64xf32, #tpu.memory_space<vmem>>, %arg8: memref<64x128xbf16, #tpu.memory_space<vmem>>, %arg9: memref<1x128xf32, #tpu.memory_space<vmem>>, %arg10: memref<8x128xf32, #tpu.memory_space<vmem>>) attributes {dimension_semantics = [#tpu.dimension_semantics<parallel>], iteration_bounds = array<i64: 1>, scalar_prefetch = 0 : i64, scratch_operands = 0 : i64, tpu.core_type = #tpu.core_type<tc>, window_params = [{transform_indices = @transform_0, window_bounds = array<i64: 8, 32>}, {pipeline_mode = #tpu.pipeline_mode<synchronous>, transform_indices = @transform_1, window_bounds = array<i64: 32, 256>}, {pipeline_mode = #tpu.pipeline_mode<synchronous>, transform_indices = @transform_2, window_bounds = array<i64: 1, 256>}, {pipeline_mode = #tpu.pipeline_mode<synchronous>, transform_indices = @transform_3, window_bounds = array<i64: 256, 128>}, {pipeline_mode = #tpu.pipeline_mode<synchronous>, transform_indices = @transform_4, window_bounds = array<i64: 1, 128>}, {pipeline_mode = #tpu.pipeline_mode<synchronous>, transform_indices = @transform_5, window_bounds = array<i64: 128, 64>}, {pipeline_mode = #tpu.pipeline_mode<synchronous>, transform_indices = @transform_6, window_bounds = array<i64: 1, 64>}, {pipeline_mode = #tpu.pipeline_mode<synchronous>, transform_indices = @transform_7, window_bounds = array<i64: 64, 128>}, {pipeline_mode = #tpu.pipeline_mode<synchronous>, transform_indices = @transform_8, window_bounds = array<i64: 1, 128>}, {transform_indices = @transform_9, window_bounds = array<i64: 8, 128>}]} {
    %c0 = arith.constant 0 : index
    %c0_0 = arith.constant 0 : index
    %0 = vector.load %arg1[%c0, %c0_0] : memref<8x32xbf16, #tpu.memory_space<vmem>>, vector<8x32xbf16>
    %c0_1 = arith.constant 0 : index
    %c0_2 = arith.constant 0 : index
    %1 = vector.load %arg2[%c0_1, %c0_2] : memref<32x256xbf16, #tpu.memory_space<vmem>>, vector<32x256xbf16>
    %cst = arith.constant dense<0.000000e+00> : vector<8x256xf32>
    %2 = tpu.matmul %0, %1, %cst {dimension_numbers = #tpu.dot_dimension_numbers<[1], [0], [0], [1], [0, 0, 1, 1], [], []>} : vector<8x32xbf16>, vector<32x256xbf16>, vector<8x256xf32> -> vector<8x256xf32>
    %c0_3 = arith.constant 0 : index
    %c0_4 = arith.constant 0 : index
    %3 = vector.load %arg3[%c0_3, %c0_4] : memref<1x256xf32, #tpu.memory_space<vmem>>, vector<1x256xf32>
    %4 = vector.broadcast %3 : vector<1x256xf32> to vector<8x256xf32>
    %5 = arith.addf %2, %4 : vector<8x256xf32>
    %6 = math.tanh %5 : vector<8x256xf32>
    %7 = arith.truncf %6 : vector<8x256xf32> to vector<8x256xbf16>
    %c0_5 = arith.constant 0 : index
    %c0_6 = arith.constant 0 : index
    %8 = vector.load %arg4[%c0_5, %c0_6] : memref<256x128xbf16, #tpu.memory_space<vmem>>, vector<256x128xbf16>
    %cst_7 = arith.constant dense<0.000000e+00> : vector<8x128xf32>
    %9 = tpu.matmul %7, %8, %cst_7 {dimension_numbers = #tpu.dot_dimension_numbers<[1], [0], [0], [1], [0, 0, 1, 1], [], []>} : vector<8x256xbf16>, vector<256x128xbf16>, vector<8x128xf32> -> vector<8x128xf32>
    %c0_8 = arith.constant 0 : index
    %c0_9 = arith.constant 0 : index
    %10 = vector.load %arg5[%c0_8, %c0_9] : memref<1x128xf32, #tpu.memory_space<vmem>>, vector<1x128xf32>
    %11 = vector.broadcast %10 : vector<1x128xf32> to vector<8x128xf32>
    %12 = arith.addf %9, %11 : vector<8x128xf32>
    %13 = math.tanh %12 : vector<8x128xf32>
    %14 = arith.truncf %13 : vector<8x128xf32> to vector<8x128xbf16>
    %c0_10 = arith.constant 0 : index
    %c0_11 = arith.constant 0 : index
    %15 = vector.load %arg6[%c0_10, %c0_11] : memref<128x64xbf16, #tpu.memory_space<vmem>>, vector<128x64xbf16>
    %cst_12 = arith.constant dense<0.000000e+00> : vector<8x64xf32>
    %16 = tpu.matmul %14, %15, %cst_12 {dimension_numbers = #tpu.dot_dimension_numbers<[1], [0], [0], [1], [0, 0, 1, 1], [], []>} : vector<8x128xbf16>, vector<128x64xbf16>, vector<8x64xf32> -> vector<8x64xf32>
    %c0_13 = arith.constant 0 : index
    %c0_14 = arith.constant 0 : index
    %17 = vector.load %arg7[%c0_13, %c0_14] : memref<1x64xf32, #tpu.memory_space<vmem>>, vector<1x64xf32>
    %18 = vector.broadcast %17 : vector<1x64xf32> to vector<8x64xf32>
    %19 = arith.addf %16, %18 : vector<8x64xf32>
    %20 = math.tanh %19 : vector<8x64xf32>
    %21 = arith.truncf %20 : vector<8x64xf32> to vector<8x64xbf16>
    %c0_15 = arith.constant 0 : index
    %c0_16 = arith.constant 0 : index
    %22 = vector.load %arg8[%c0_15, %c0_16] : memref<64x128xbf16, #tpu.memory_space<vmem>>, vector<64x128xbf16>
    %cst_17 = arith.constant dense<0.000000e+00> : vector<8x128xf32>
    %23 = tpu.matmul %21, %22, %cst_17 {dimension_numbers = #tpu.dot_dimension_numbers<[1], [0], [0], [1], [0, 0, 1, 1], [], []>} : vector<8x64xbf16>, vector<64x128xbf16>, vector<8x128xf32> -> vector<8x128xf32>
    %c0_18 = arith.constant 0 : index
    %c0_19 = arith.constant 0 : index
    %24 = vector.load %arg9[%c0_18, %c0_19] : memref<1x128xf32, #tpu.memory_space<vmem>>, vector<1x128xf32>
    %25 = vector.broadcast %24 : vector<1x128xf32> to vector<8x128xf32>
    %26 = arith.addf %23, %25 : vector<8x128xf32>
    %27 = tpu.iota {dimensions = array<i32: 1>} : vector<8x128xi32>
    %c16_i32 = arith.constant 16 : i32
    %28 = vector.broadcast %c16_i32 : i32 to vector<8x128xi32>
    %29 = arith.cmpi slt, %27, %28 : vector<8x128xi32>
    %30 = math.tanh %26 : vector<8x128xf32>
    %31 = arith.select %29, %30, %26 : vector<8x128xi1>, vector<8x128xf32>
    %c0_20 = arith.constant 0 : index
    %c0_21 = arith.constant 0 : index
    %32 = vector.load %arg10[%c0_20, %c0_21] : memref<8x128xf32, #tpu.memory_space<vmem>>, vector<8x128xf32>
    tpu.vector_store %arg10[%c0_20, %c0_21], %31 {strides = array<i32>} : memref<8x128xf32, #tpu.memory_space<vmem>>, vector<8x128xf32>,
    return
  }
  func.func @transform_0(%arg0: i32) -> (i32, i32) {
    %c0_i32 = arith.constant 0 : i32
    %c0_i32_0 = arith.constant 0 : i32
    return %arg0, %c0_i32 : i32, i32
  }
  func.func @transform_1(%arg0: i32) -> (i32, i32) {
    %c0_i32 = arith.constant 0 : i32
    %c0_i32_0 = arith.constant 0 : i32
    %c0_i32_1 = arith.constant 0 : i32
    return %c0_i32, %c0_i32_0 : i32, i32
  }
  func.func @transform_2(%arg0: i32) -> (i32, i32) {
    %c0_i32 = arith.constant 0 : i32
    %c0_i32_0 = arith.constant 0 : i32
    %c0_i32_1 = arith.constant 0 : i32
    return %c0_i32, %c0_i32_0 : i32, i32
  }
  func.func @transform_3(%arg0: i32) -> (i32, i32) {
    %c0_i32 = arith.constant 0 : i32
    %c0_i32_0 = arith.constant 0 : i32
    %c0_i32_1 = arith.constant 0 : i32
    return %c0_i32, %c0_i32_0 : i32, i32
  }
  func.func @transform_4(%arg0: i32) -> (i32, i32) {
    %c0_i32 = arith.constant 0 : i32
    %c0_i32_0 = arith.constant 0 : i32
    %c0_i32_1 = arith.constant 0 : i32
    return %c0_i32, %c0_i32_0 : i32, i32
  }
  func.func @transform_5(%arg0: i32) -> (i32, i32) {
    %c0_i32 = arith.constant 0 : i32
    %c0_i32_0 = arith.constant 0 : i32
    %c0_i32_1 = arith.constant 0 : i32
    return %c0_i32, %c0_i32_0 : i32, i32
  }
  func.func @transform_6(%arg0: i32) -> (i32, i32) {
    %c0_i32 = arith.constant 0 : i32
    %c0_i32_0 = arith.constant 0 : i32
    %c0_i32_1 = arith.constant 0 : i32
    return %c0_i32, %c0_i32_0 : i32, i32
  }
  func.func @transform_7(%arg0: i32) -> (i32, i32) {
    %c0_i32 = arith.constant 0 : i32
    %c0_i32_0 = arith.constant 0 : i32
    %c0_i32_1 = arith.constant 0 : i32
    return %c0_i32, %c0_i32_0 : i32, i32
  }
  func.func @transform_8(%arg0: i32) -> (i32, i32) {
    %c0_i32 = arith.constant 0 : i32
    %c0_i32_0 = arith.constant 0 : i32
    %c0_i32_1 = arith.constant 0 : i32
    return %c0_i32, %c0_i32_0 : i32, i32
  }
  func.func @transform_9(%arg0: i32) -> (i32, i32) {
    %c0_i32 = arith.constant 0 : i32
    %c0_i32_0 = arith.constant 0 : i32
    return %arg0, %c0_i32 : i32, i32
  }
}

</mosaic_0001>

<bundles_post_ra>
// kernel: encoder_forward.1
= control target key start
LH: loop header
LB: loop body
LE: loop exit
PB: predicated region body
PF: predicated region fallthrough
CT: control target
= control target key end

     0   :  { %v654_v1 = vmov 0   ;;  %vm70_vm0 = vcmask 261120   ;;  %v655_v22 = vmov 0.0   ;;  %v40_v26 = vlaneseq  ;;  %s837_s1 = inlined_call_operand.vmem [shape: bf16[32,256], index: 1, kind: input, shape index: {}]   ;;  %s838_s3 = inlined_call_operand.vmem [shape: bf16[256,128], index: 3, kind: input, shape index: {}]   ;;  %s839_s0 = inlined_call_operand.vmem [shape: bf16[8,32], index: 0, kind: input, shape index: {}]   ;;  %s840_s5 = inlined_call_operand.vmem [shape: bf16[128,64], index: 5, kind: input, shape index: {}]   ;;  %s841_s2 = inlined_call_operand.vmem [shape: f32[1,256], index: 2, kind: input, shape index: {}]   ;;  %s842_s4 = inlined_call_operand.vmem [shape: f32[1,128], index: 4, kind: input, shape index: {}]   ;;  %s843_s7 = inlined_call_operand.vmem [shape: bf16[64,128], index: 7, kind: input, shape index: {}]   ;;  %s844_s6 = inlined_call_operand.vmem [shape: f32[1,64], index: 6, kind: input, shape index: {}]   ;;  %s845_s8 = inlined_call_operand.vmem [shape: f32[1,128], index: 8, kind: input, shape index: {}]   ;;  %s846_s9 = inlined_call_operand.vmem [shape: f32[8,128], index: 9, kind: output, shape index: {}]  }
   0x1   :  { %v610_v0 = vld [vmem:[%s837_s1 + $0x4] ss:$8 sps:$4 sm:$0xff]   ;;  %106 = vmatprep.mubr.bf16.mxu0 %v654_v1  ;;  %v612_v2 = vld [vmem:[%s837_s1] ss:$8 sps:$4 sm:$0xff]   ;;  %v613_v3 = vld [vmem:[%s837_s1 + $0x14] ss:$8 sps:$4 sm:$0xff]  }
   0x2   :  { %74 = vmatprep.subr.bf16.mxu0 %v610_v0  ;;  %v615_v4 = vld [vmem:[%s837_s1 + $0x10] ss:$8 sps:$4 sm:$0xff]   ;;  %v616_v5 = vld [vmem:[%s838_s3 + $0x40] sm:$0xff]   ;;  %v618_v8 = vld [vmem:[%s838_s3 + $0x48] sm:$0xff]   ;;  %v41_v27 = vshrl.u32 %v40_v26, 7  ;;  %vm656_vm1 = vmmov 0  }
   0x3   :  { %75 = vmatpush1.bf16.msra.mxu0 %v612_v2  ;;  %v617_v6 = vld [vmem:[%s838_s3] sm:$0xff]   ;;  %539 = vmatprep.subr.bf16.mxu1 %v616_v5  ;;  %v619_v9 = vld [vmem:[%s838_s3 + $0x8] sm:$0xff]   ;;  %v620_v10 = vld [vmem:[%s838_s3 + $0x50] sm:$0xff]   ;;  %vm448_vm2 = vcmask 523264  }
   0x4   :  { %76 = vmatprep.subr.bf16.mxu0 %v613_v3  ;;  %v33_v7 = vld [vmem:[%s839_s0] sm:$0xf]  ;;  %540 = vmatpush3.bf16.msra.mxu1 %v617_v6  ;;  %v621_v11 = vld [vmem:[%s838_s3 + $0x10] sm:$0xff]   ;;  %v622_v12 = vld [vmem:[%s838_s3 + $0x58] sm:$0xff]   ;;  %v42_v28 = vsub.s32 0, %v41_v27  ;;  %v46_v30 = vsub.s32 1, %v41_v27 }
   0x5   :  { %541 = vmatprep.subr.bf16.mxu1 %v618_v8  ;;  %v623_v13 = vld [vmem:[%s838_s3 + $0x18] sm:$0xff]   ;;  %v624_v14 = vld [vmem:[%s838_s3 + $0x60] sm:$0xff]   ;;  %v626_v16 = vld [vmem:[%s838_s3 + $0x68] sm:$0xff]  }
   0x6   :  { %v625_v15 = vld [vmem:[%s838_s3 + $0x20] sm:$0xff]   ;;  %v627_v17 = vld [vmem:[%s838_s3 + $0x28] sm:$0xff]   ;;  %v628_v18 = vld [vmem:[%s838_s3 + $0x70] sm:$0xff]  }
   0x7   :  { %77 = vmatpush1.bf16.msra.mxu0 %v615_v4  ;;  %v629_v19 = vld [vmem:[%s838_s3 + $0x30] sm:$0xff]   ;;  %v630_v20 = vld [vmem:[%s838_s3 + $0x78] sm:$0xff]   ;;  %v632_v23 = vld [vmem:[%s840_s5] sm:$0xff]  }
   0x8   :  { %542 = vmatpush3.bf16.msra.mxu1 %v619_v9  ;;  %v631_v21 = vld [vmem:[%s838_s3 + $0x38] sm:$0xff]   ;;  %575 = vmatprep.subr.bf16.mxu0 %v655_v22  ;;  %v633_v24 = vld [vmem:[%s840_s5 + $0x8] sm:$0xff]   ;;  %v634_v25 = vld [vmem:[%s840_s5 + $0x10] sm:$0xff]  }
   0x9   :  { %543 = vmatprep.subr.bf16.mxu1 %v620_v10  ;;  %v38_v29 = vld [vmem:[%s841_s2] sm:$0x3]  ;;  %v635_v43 = vld [vmem:[%s840_s5 + $0x18] sm:$0xff]   ;;  %v637_v45 = vld [vmem:[%s840_s5 + $0x28] sm:$0xff]  }
   0xa   :  { %506 = vmatmul.mubr.msk.bf16.vlgmr.msra.gmra.mrb[0].mxu0 %vm70_vm0, %v33_v7  ;;  %v43_v31 = vrot.slane %v38_v29, %v42_v28  ;;  %v47_v32 = vrot.slane %v38_v29, %v46_v30  ;;  %v636_v44 = vld [vmem:[%s840_s5 + $0x20] sm:$0xff]   ;;  %v638_v46 = vld [vmem:[%s840_s5 + $0x30] sm:$0xff]   ;;  %v639_v47 = vld [vmem:[%s840_s5 + $0x38] sm:$0xff]  }
   0xb   :  { %576 = vmatpush3.bf16.msra.mxu0 %v632_v23  ;;  %591 = vmatprep.mubr.msk.bf16.mxu0 %vm656_vm1, %v655_v22  ;;  %v507_v49 = vld [vmem:[%s842_s4] ss:$0 sm:$0xff]  ;;  %v641_v58 = vld [vmem:[%s843_s7 + $0x8] sm:$0xff]   ;;  %v642_v59 = vld [vmem:[%s843_s7 + $0x10] sm:$0xff]  }
   0xc   :  { %544 = vmatpush3.bf16.msra.mxu1 %v621_v11  ;;  %577 = vmatprep.subr.bf16.mxu0 %v655_v22  ;;  %v640_v57 = vld [vmem:[%s843_s7] sm:$0xff]   ;;  %v643_v60 = vld [vmem:[%s843_s7 + $0x18] sm:$0xff]   ;;  %v493_v11 = vand.u32 127, %v40_v26 }
   0xd   :  { %545 = vmatprep.subr.bf16.mxu1 %v622_v12  ;;  %v524_v61 = vld [vmem:[%s844_s6] ss:$0 sm:$0xff] }
   0xe   :  { %v533_v5 = vld [vmem:[%s845_s8] ss:$0 sm:$0xff]  ;;  %vm494_vm3 = vcmp.lt.s32.totalorder %v493_v11, 16 }
   0xf   :  { %578 = vmatpush3.bf16.msra.mxu0 %v633_v24 }
  0x10   :  { %546 = vmatpush3.bf16.msra.mxu1 %v623_v13  ;;  %579 = vmatprep.subr.bf16.mxu0 %v655_v22 }
  0x11   :  { %547 = vmatprep.subr.bf16.mxu1 %v624_v14 }
  0x13   :  { %580 = vmatpush3.bf16.msra.mxu0 %v634_v25 }
  0x14   :  { %548 = vmatpush3.bf16.msra.mxu1 %v625_v15  ;;  %581 = vmatprep.subr.bf16.mxu0 %v655_v22 }
  0x15   :  { %549 = vmatprep.subr.bf16.mxu1 %v626_v16 }
  0x17   :  { %582 = vmatpush3.bf16.msra.mxu0 %v635_v43 }
  0x18   :  { %550 = vmatpush3.bf16.msra.mxu1 %v627_v17  ;;  %583 = vmatprep.subr.bf16.mxu0 %v655_v22 }
  0x19   :  { %551 = vmatprep.subr.bf16.mxu1 %v628_v18 }
  0x1b   :  { %584 = vmatpush3.bf16.msra.mxu0 %v636_v44 }
  0x1c   :  { %552 = vmatpush3.bf16.msra.mxu1 %v629_v19  ;;  %585 = vmatprep.subr.bf16.mxu0 %v655_v22 }
  0x1d   :  { %553 = vmatprep.subr.bf16.mxu1 %v630_v20 }
  0x1f   :  { %586 = vmatpush3.bf16.msra.mxu0 %v637_v45 }
  0x20   :  { %554 = vmatpush3.bf16.msra.mxu1 %v631_v21  ;;  %587 = vmatprep.subr.bf16.mxu0 %v655_v22 }
  0x21   :  { %595 = vmatprep.subr.bf16.mxu1 %v655_v22 }
  0x23   :  { %588 = vmatpush3.bf16.msra.mxu0 %v638_v46 }
  0x24   :  { %589 = vmatprep.subr.bf16.mxu0 %v655_v22 }
  0x27   :  { %590 = vmatpush3.bf16.msra.mxu0 %v639_v47 }
  0xdd   :  { %v108_v33 = vpop.f32.mrb[0].mxu0 }
  0xde   :  { %v109_v34 = vadd.f32 %v108_v33, %v43_v31  ;;  %v110_v35 = vpop.f32.mrb[1].mxu0 }
  0xdf   :  { %v111_v36 = vadd.f32 %v110_v35, %v47_v32  ;;  %v112_v37 = vpop.f32.mrb[2].mxu0 }
  0xe0   :  { %644 = vtanh.f32 %v109_v34  ;;  %v113_v38 = vpop.f32.mrb[3].mxu0 }
  0xe1   :  { %646 = vtanh.f32 %v111_v36 }
  0xea   :  { %v645_v39 = vpop.eup %644 }
  0xeb   :  { %v647_v40 = vpop.eup %646  ;;  %v117_v42 = vpack.c.bf16 %v645_v39, %v645_v39 }
  0xec   :  { %v118_v41 = vpack.c.bf16 %v647_v40, %v647_v40 }
  0xee   :  { %286 = vmatprep.mubr.bf16.mxu1 %v118_v41 }
  0xef   :  { %287 = vmatmul.mubr.bf16.vlgmr.msra.gmra.mrb[0].mxu1 %v117_v42 }
  0xf0   :  { %603 = vmatprep.mubr.msk.bf16.mxu1 %vm656_vm1, %v655_v22  ;;  %596 = vmatpush3.bf16.msra.mxu1 %v640_v57 }
  0xf1   :  { %597 = vmatprep.subr.bf16.mxu1 %v655_v22 }
  0xf4   :  { %598 = vmatpush3.bf16.msra.mxu1 %v641_v58 }
  0xf5   :  { %599 = vmatprep.subr.bf16.mxu1 %v655_v22 }
  0xf8   :  { %600 = vmatpush3.bf16.msra.mxu1 %v642_v59 }
  0xf9   :  { %601 = vmatprep.subr.bf16.mxu1 %v655_v22 }
  0xfc   :  { %602 = vmatpush3.bf16.msra.mxu1 %v643_v60 }
 0x1c2   :  { %v555_v48 = vpop.f32.mrb[0].mxu1 }
 0x1c3   :  { %v556_v50 = vpop.f32.mrb[1].mxu1 }
 0x1c4   :  { %v557_v51 = vadd.f32 %v556_v50, %v555_v48  ;;  %v558_v52 = vpop.f32.mrb[2].mxu1 }
 0x1c5   :  { %v559_v53 = vpop.f32.mrb[3].mxu1 }
 0x1c6   :  { %v289_v54 = vadd.f32 %v557_v51, %v507_v49 }
 0x1c8   :  { %648 = vtanh.f32 %v289_v54 }
 0x1d2   :  { %v649_v55 = vpop.eup %648 }
 0x1d3   :  { %v295_v56 = vpack.c.bf16 %v649_v55, %v649_v55 }
 0x1d5   :  { %592 = vmatmul.mubr.bf16.vlgmr.msra.gmra.mrb[4].mxu0 %v295_v56 }
 0x2a8   :  { %v401_v62 = vpop.f32.mrb[4].mxu0 }
 0x2a9   :  { %v402_v63 = vadd.f32 %v524_v61, %v401_v62  ;;  %v593_v0 = vpop.f32.mrb[5].mxu0 }
 0x2aa   :  { %v404_v1 = vpop.f32.mrb[6].mxu0 }
 0x2ab   :  { %650 = vtanh.f32 %v402_v63  ;;  %v594_v2 = vpop.f32.mrb[7].mxu0 }
 0x2b5   :  { %v651_v3 = vpop.eup %650 }
 0x2b6   :  { %v408_v4 = vpack.c.bf16 %v651_v3, %v651_v3 }
 0x2b8   :  { %604 = vmatmul.mubr.msk.bf16.vlgmr.msra.gmra.mrb[4].mxu1 %vm448_vm2, %v408_v4 }
 0x38b   :  { %v486_v6 = vpop.f32.mrb[4].mxu1 }
 0x38c   :  { %v487_v7 = vadd.f32 %v533_v5, %v486_v6  ;;  %v605_v8 = vpop.f32.mrb[5].mxu1 }
 0x38d   :  { %v489_v9 = vpop.f32.mrb[6].mxu1 }
 0x38e   :  { %652 = vtanh.f32 %v487_v7  ;;  %v606_v10 = vpop.f32.mrb[7].mxu1 }
 0x398   :  { %v653_v12 = vpop.eup %652 }
 0x399   :  { %v496_v13 = vsel %vm494_vm3, %v653_v12, %v487_v7 }
 0x39a   :  { %497 = vst [vmem:[%s846_s9] sm:$0xff] %v496_v13 }

</bundles_post_ra>
